<compile_context>
chip_gen: v6e
topology: v6e:2x2x1
jax: 0.10.0
libtpu: 0.0.40
codegen_flags: <defaults>
</compile_context>

<pallas_src>
import jax
import jax.numpy as jnp
from jax.experimental import pallas as pl
from jax.experimental.pallas import tpu as pltpu


def _round_up(x, m):
    return ((x + m - 1) // m) * m


def _downsample_matmul_kernel(p_ref, w_ref, o_ref, acc_ref):
    # p_ref:   (tk, tm)   patch block: folded (kh,kw,cin[,bias-ones]) taps on
    #                     sublanes, flattened Ho*Wo positions on lanes.
    # w_ref:   (N_r, tk)  folded weight block (last real K column = bias).
    # o_ref:   (N_r, tm)  output tile: out-channels on sublanes, Ho*Wo on lanes.
    # acc_ref: (N_r, tm)  f32 accumulator, resident across the K grid axis.
    k = pl.program_id(2)

    @pl.when(k == 0)
    def _():
        acc_ref[...] = jnp.zeros_like(acc_ref)

    acc_ref[...] += jnp.dot(w_ref[...], p_ref[...],
                            preferred_element_type=jnp.float32)

    @pl.when(k == pl.num_programs(2) - 1)
    def _():
        o_ref[...] = acc_ref[...].astype(o_ref.dtype)


def downsample_forward(x_nchw, weight, bias, *, stride=2, padding=1,
                       compute_dtype=jnp.bfloat16, tile_m=512, tile_k=1024):
    """Conv2d(kernel=3, stride=stride, padding=padding) matching nn.Conv2d.

    x_nchw: (B, Cin, H, W); weight: (Cout, Cin, 3, 3) [PyTorch OIHW]; bias: (Cout,)
    returns (B, Cout, Ho, Wo) in x_nchw.dtype.
    """
    assert tile_m % 128 == 0 and tile_k % 128 == 0
    B, Cin, H, W = x_nchw.shape
    Cout = weight.shape[0]
    Ho = (H + 2 * padding - 3) // stride + 1
    Wo = (W + 2 * padding - 3) // stride + 1
    M = Ho * Wo
    out_dtype = x_nchw.dtype

    # ---- XLA glue: bf16, NCHW-native im2col -> no wrapper transposes --------
    x = x_nchw.astype(compute_dtype)                  # cast BEFORE the glue
    x = jnp.pad(x, ((0, 0), (0, 0), (padding, padding), (padding, padding)))
    taps = []
    for kh in range(3):
        for kw in range(3):
            t = x[:, :, kh:kh + stride * Ho:stride, kw:kw + stride * Wo:stride]
            taps.append(t.reshape(B, Cin, M))
    taps.append(jnp.ones((B, 1, M), compute_dtype))   # ones row carries the bias
    patches = jnp.concatenate(taps, axis=1)           # (B, K, M), K-major, M on lanes

    K = 9 * Cin + 1
    # Tiling: K on sublanes (mult of 8), M on lanes (mult of 128).
    tm = min(_round_up(M, 128), tile_m)
    tk = min(_round_up(K, 8), tile_k)                 # == K_r (full dim) when small
    M_r = _round_up(M, tm)
    K_r = _round_up(K, tk)
    N_r = _round_up(max(Cout, 8), 8)
    n_m, n_k = M_r // tm, K_r // tk

    patches = jnp.pad(patches, ((0, 0), (0, K_r - K), (0, M_r - M)))

    # weight OIHW -> (Cout, kh, kw, Cin) -> (Cout, 9*Cin): same K order as the
    # taps above; bias appended as the last K column (pairs with the ones row).
    w2d = jnp.transpose(weight.astype(compute_dtype), (0, 2, 3, 1)).reshape(Cout, 9 * Cin)
    w_fold = jnp.concatenate(
        [w2d, bias.astype(compute_dtype).reshape(Cout, 1)], axis=-1)
    w_fold = jnp.pad(w_fold, ((0, N_r - Cout), (0, K_r - K)))      # (N_r, K_r)

    # Explicit VMEM budget: 2x patch block + 2x weight block + 2x out + f32 acc.
    csz = jnp.dtype(compute_dtype).itemsize
    osz = jnp.dtype(out_dtype).itemsize
    need = (2 * tk * tm * csz + 2 * N_r * tk * csz
            + 2 * N_r * tm * osz + N_r * tm * 4)
    vmem_limit = int(min(56 * 2**20, max(2 * need, 32 * 2**20)))

    cost = pl.CostEstimate(
        flops=2 * B * M_r * K_r * N_r,
        transcendentals=0,
        bytes_accessed=(B * K_r * M_r * csz
                        + n_m * B * N_r * K_r * csz
                        + B * N_r * M_r * osz),
    )

    out = pl.pallas_call(
        _downsample_matmul_kernel,
        out_shape=jax.ShapeDtypeStruct((B, N_r, M_r), out_dtype),
        grid_spec=pltpu.PrefetchScalarGridSpec(
            num_scalar_prefetch=0,
            grid=(B, n_m, n_k),                        # K innermost (reduction)
            in_specs=[
                # patch block (tk, tm); leading batch dim squeezed out.
                pl.BlockSpec((None, tk, tm), lambda b, m, k: (b, k, m)),
                # folded weight block (N_r, tk).
                pl.BlockSpec((N_r, tk), lambda b, m, k: (0, k)),
            ],
            out_specs=pl.BlockSpec((None, N_r, tm), lambda b, m, k: (b, 0, m)),
            scratch_shapes=[pltpu.VMEM((N_r, tm), jnp.float32)],
        ),
        compiler_params=pltpu.CompilerParams(
            dimension_semantics=("parallel", "parallel", "arbitrary"),
            vmem_limit_bytes=vmem_limit,
        ),
        cost_estimate=cost,
    )(patches, w_fold)

    # Output is already (B, Cout_r, M_r): pure slice + reshape to NCHW.
    return out[:, :Cout, :M].reshape(B, Cout, Ho, Wo)


if __name__ == "__main__":
    key = jax.random.PRNGKey(0)
    k_x, k_w, k_b = jax.random.split(key, 3)

    # Downsample(channels=4, use_conv=True, dims=2) on a (2, 4, 16, 16) input
    B, C, H, W = 2, 4, 16, 16
    Cout = C

    x = jax.random.normal(k_x, (B, C, H, W), jnp.float32)

    # Deterministic Conv2d-style init (uniform in +/- 1/sqrt(fan_in)).
    fan_in = C * 3 * 3
    bound = 1.0 / (fan_in ** 0.5)
    weight = jax.random.uniform(k_w, (Cout, C, 3, 3), jnp.float32, -bound, bound)
    bias = jax.random.uniform(k_b, (Cout,), jnp.float32, -bound, bound)

    out = jax.block_until_ready(jax.jit(downsample_forward)(x, weight, bias))
    assert out.shape == (B, Cout, H // 2, W // 2), out.shape

    # Reference 1 (tight): same bf16 rounding of inputs/weights/bias, f32 accum.
    x_bf = x.astype(jnp.bfloat16).astype(jnp.float32)
    w_bf = weight.astype(jnp.bfloat16).astype(jnp.float32)
    b_bf = bias.astype(jnp.bfloat16).astype(jnp.float32)
    ref_bf = jax.lax.conv_general_dilated(
        x_bf, w_bf, window_strides=(2, 2), padding=((1, 1), (1, 1)),
        dimension_numbers=("NCHW", "OIHW", "NCHW"),
        precision=jax.lax.Precision.HIGHEST,
    ) + b_bf[None, :, None, None]

    # Reference 2 (loose): full-f32 conv, bounds the bf16 compute error.
    ref_f32 = jax.lax.conv_general_dilated(
        x, weight, window_strides=(2, 2), padding=((1, 1), (1, 1)),
        dimension_numbers=("NCHW", "OIHW", "NCHW"),
        precision=jax.lax.Precision.HIGHEST,
    ) + bias[None, :, None, None]

    assert jnp.allclose(out, ref_bf, atol=1e-3, rtol=1e-3), \
        float(jnp.max(jnp.abs(out - ref_bf)))
    assert jnp.allclose(out, ref_f32, atol=5e-2, rtol=5e-2), \
        float(jnp.max(jnp.abs(out - ref_f32)))
    print("KERNEL_OK")
</pallas_src>

<mosaic_0001>
module attributes {stable_mosaic.version = 11 : i64} {
  func.func @_downsample_matmul_kernel(%arg0: i32, %arg1: i32, %arg2: i32, %arg3: memref<1x40x128xbf16, #tpu.memory_space<vmem>>, %arg4: memref<8x40xbf16, #tpu.memory_space<vmem>>, %arg5: memref<1x8x128xf32, #tpu.memory_space<vmem>>, %arg6: memref<8x128xf32, #tpu.memory_space<vmem>>) attributes {dimension_semantics = [#tpu.dimension_semantics<parallel>, #tpu.dimension_semantics<parallel>, #tpu.dimension_semantics<arbitrary>], iteration_bounds = array<i64: 2, 1, 1>, scalar_prefetch = 0 : i64, scratch_operands = 1 : i64, tpu.core_type = #tpu.core_type<tc>, window_params = [{transform_indices = @transform_0, window_bounds = array<i64: 1, 40, 128>}, {transform_indices = @transform_1, window_bounds = array<i64: 8, 40>}, {transform_indices = @transform_2, window_bounds = array<i64: 1, 8, 128>}]} {
    %c0_i32 = arith.constant 0 : i32
    %0 = arith.cmpi eq, %arg2, %c0_i32 : i32
    %1 = arith.extui %0 : i1 to i32
    %c0_i32_0 = arith.constant 0 : i32
    %2 = arith.cmpi ne, %1, %c0_i32_0 : i32
    scf.if %2 {
      %cst_11 = arith.constant 0.000000e+00 : f32
      %13 = vector.broadcast %cst_11 : f32 to vector<8x128xf32>
      %c0_12 = arith.constant 0 : index
      %c0_13 = arith.constant 0 : index
      %14 = vector.load %arg6[%c0_12, %c0_13] : memref<8x128xf32, #tpu.memory_space<vmem>>, vector<8x128xf32>
      tpu.vector_store %arg6[%c0_12, %c0_13], %13 {strides = array<i32>} : memref<8x128xf32, #tpu.memory_space<vmem>>, vector<8x128xf32>,
    } else {
    }
    %c0 = arith.constant 0 : index
    %c0_1 = arith.constant 0 : index
    %3 = vector.load %arg6[%c0, %c0_1] : memref<8x128xf32, #tpu.memory_space<vmem>>, vector<8x128xf32>
    %c0_2 = arith.constant 0 : index
    %c0_3 = arith.constant 0 : index
    %4 = vector.load %arg4[%c0_2, %c0_3] : memref<8x40xbf16, #tpu.memory_space<vmem>>, vector<8x40xbf16>
    %c0_4 = arith.constant 0 : index
    %c0_5 = arith.constant 0 : index
    %c0_6 = arith.constant 0 : index
    %5 = vector.load %arg3[%c0_4, %c0_5, %c0_6] : memref<1x40x128xbf16, #tpu.memory_space<vmem>>, vector<1x40x128xbf16>
    %6 = vector.shape_cast %5 : vector<1x40x128xbf16> to vector<40x128xbf16>
    %cst = arith.constant dense<0.000000e+00> : vector<8x128xf32>
    %7 = tpu.matmul %4, %6, %cst {dimension_numbers = #tpu.dot_dimension_numbers<[1], [0], [0], [1], [0, 0, 1, 1], [], []>} : vector<8x40xbf16>, vector<40x128xbf16>, vector<8x128xf32> -> vector<8x128xf32>
    %8 = arith.addf %3, %7 : vector<8x128xf32>
    %c0_7 = arith.constant 0 : index
    %c0_8 = arith.constant 0 : index
    %9 = vector.load %arg6[%c0_7, %c0_8] : memref<8x128xf32, #tpu.memory_space<vmem>>, vector<8x128xf32>
    tpu.vector_store %arg6[%c0_7, %c0_8], %8 {strides = array<i32>} : memref<8x128xf32, #tpu.memory_space<vmem>>, vector<8x128xf32>,
    %c0_i32_9 = arith.constant 0 : i32
    %10 = arith.cmpi eq, %arg2, %c0_i32_9 : i32
    %11 = arith.extui %10 : i1 to i32
    %c0_i32_10 = arith.constant 0 : i32
    %12 = arith.cmpi ne, %11, %c0_i32_10 : i32
    scf.if %12 {
      %c0_11 = arith.constant 0 : index
      %c0_12 = arith.constant 0 : index
      %13 = vector.load %arg6[%c0_11, %c0_12] : memref<8x128xf32, #tpu.memory_space<vmem>>, vector<8x128xf32>
      %c0_13 = arith.constant 0 : index
      %c0_14 = arith.constant 0 : index
      %c0_15 = arith.constant 0 : index
      %14 = vector.load %arg5[%c0_13, %c0_14, %c0_15] : memref<1x8x128xf32, #tpu.memory_space<vmem>>, vector<1x8x128xf32>
      %15 = vector.shape_cast %14 : vector<1x8x128xf32> to vector<8x128xf32>
      %16 = vector.shape_cast %13 : vector<8x128xf32> to vector<1x8x128xf32>
      tpu.vector_store %arg5[%c0_13, %c0_14, %c0_15], %16 {strides = array<i32>} : memref<1x8x128xf32, #tpu.memory_space<vmem>>, vector<1x8x128xf32>,
    } else {
    }
    return
  }
  func.func @transform_0(%arg0: i32, %arg1: i32, %arg2: i32) -> (i32, i32, i32) {
    %c0_i32 = arith.constant 0 : i32
    return %arg0, %arg2, %arg1 : i32, i32, i32
  }
  func.func @transform_1(%arg0: i32, %arg1: i32, %arg2: i32) -> (i32, i32) {
    %c0_i32 = arith.constant 0 : i32
    %c0_i32_0 = arith.constant 0 : i32
    return %c0_i32, %arg2 : i32, i32
  }
  func.func @transform_2(%arg0: i32, %arg1: i32, %arg2: i32) -> (i32, i32, i32) {
    %c0_i32 = arith.constant 0 : i32
    %c0_i32_0 = arith.constant 0 : i32
    return %arg0, %c0_i32, %arg1 : i32, i32, i32
  }
}

</mosaic_0001>

<bundles_post_ra>
// kernel: downsample_forward.1
= control target key start
LH: loop header
LB: loop body
LE: loop exit
PB: predicated region body
PF: predicated region fallthrough
CT: control target
= control target key end

     0   :  { %s494_s9 = smov 0   ;;  %s496_s10 = smov 0   ;;  %s530_s0 = inlined_call_operand.vmem [shape: bf16[2,40,128], index: 0, kind: input, shape index: {}]   ;;  %s531_s1 = inlined_call_operand.vmem [shape: bf16[8,40], index: 1, kind: input, shape index: {}]   ;;  %s532_s2 = inlined_call_operand.vmem [shape: f32[2,8,128], index: 2, kind: output, shape index: {}]  }
   0x1   :  { %s498_s11 = smov 0  }
   0x2 LB: > { %s31_s12 = sadd.s32 1, %s471_s10  ;;  %p400_p0 = scmp.ge.s32.totalorder %s475_s11, 1  ;;  %s475_s11 = sphi %s498_s11, %s12_s11   ;;  %s471_s10 = sphi %s496_s10, %s534_s10   ;;  %s467_s9 = sphi %s494_s9, %s533_s9  }
   0x3   : > { %p33_p1 = scmp.ge.s32.totalorder %s31_s12, 2  ;;  %p154_p2 = scmp.lt.s32.totalorder %s475_s11, 3 }
   0x5   : > { %s536_s12 = smov (%p33_p1, %s31_s12), 0  ;;  %p155_p3 = pnand %p400_p0, %p154_p2 }
   0x6   : > { %p190_p4 = scmp.lt.s32.totalorder (!%p155_p3), %s467_s9, 1 }
   0x7   : > { %158 = sbr.rel (%p155_p3) target bundleno = 228 (0xe4), region = 28 }
   0xc   : > { %v477_v0 = vmov 0.0   ;;  %vm478_vm0 = vmmov 0   ;;  %s538_s9 = smov (!%p190_p4, %s467_s9), 1  ;;  %vm245_vm1 = vcmask 1043456   ;;  %v220_v5 = vld [vmem:[%s531_s1] sm:$0xf] }
   0xd   : > { %413 = vmatprep.subr.bf16.mxu0 %v477_v0  ;;  %419 = vmatprep.mubr.msk.bf16.mxu0 %vm478_vm0, %v477_v0  ;;  %s423_s13 = smul.u32 20, %s538_s9  ;;  %vm241_vm2 = vcmask 326656   ;;  %s402_s19 = sshll.u32 %s538_s9, 3 }
   0xe   : > { %s212_s22 = scalar_lea.vmem %s532_s2, %s402_s19 }
   0xf   : > { %s200_s16 = scalar_lea.vmem %s530_s0, %s423_s13 }
  0x10   : > { %v450_v1 = vld [vmem:[%s200_s16 + $0x10] ss:$0 sps:$4 sm:$0xff]   ;;  %v451_v3 = vld [vmem:[%s200_s16 + $0x8] sm:$0xff]   ;;  %v452_v4 = vld [vmem:[%s200_s16] sm:$0xff]  }
  0x11   : > { %v247_v2 = vsel %vm245_vm1, %v450_v1, 0 }
  0x12   : > { %414 = vmatpush3.bf16.msra.mxu0 %v247_v2 }
  0x13   : > { %415 = vmatprep.subr.bf16.mxu0 %v477_v0 }
  0x16   : > { %416 = vmatpush3.bf16.msra.mxu0 %v451_v3 }
  0x17   : > { %417 = vmatprep.subr.bf16.mxu0 %v477_v0 }
  0x1a   : > { %418 = vmatpush3.bf16.msra.mxu0 %v452_v4 }
  0x1d   : > { %420 = vmatmul.mubr.msk.bf16.vlgmr.msra.gmra.mxu0 %vm241_vm2, %v220_v5 }
  0xdd   : > { %v283_v6 = vpop.f32.mrf.mxu0 }
  0xde   : > { %295 = vst [vmem:[%s212_s22] sm:$0xff] %v283_v6 }
  0xdf   : > { %v421_v7 = vpop.f32.mrf.mxu0 }
  0xe1   : > { %v286_v8 = vpop.f32.mrf.mxu0 }
  0xe3   : > { %v422_v9 = vpop.f32.mrf.mxu0 }
  0xe4 PF: > { %s12_s11 = sadd.s32 1, %s475_s11   ;;  %s533_s9 = smov %s471_s10 }
  0xe5   : > { %p9_p5 = scmp.ge.s32.totalorder %s12_s11, 4   ;;  %s534_s10 = smov %s536_s12 }
  0xe7   :  { %11 = sbr.rel (!%p9_p5) target bundleno = 2 (0x2), region = 69 }

</bundles_post_ra>
